<compile_context>
chip_gen: v7x
topology: tpu7x:2x2x1
jax: 0.10.0
libtpu: 0.0.40
codegen_flags: <defaults>
</compile_context>

<pallas_src>
import math
import jax
import jax.numpy as jnp
from jax.experimental import pallas as pl
from jax.experimental.pallas import tpu as pltpu


def _round_up(x, m):
    return (x + m - 1) // m * m


def _choose_tile(B, tm):
    """Batch-tile heuristic: big tiles to amortise ~0.35us/step grid overhead,
    but keep >=2 grid steps on medium batches (v7x dual-TC) and prefer 128-row
    multiples (clean v5e MXU passes). Never exceeds round_up(B, 8)."""
    cap = _round_up(max(B, 1), 8)
    tile = min(tm, cap)
    if B > 256 and pl.cdiv(B, tile) < 2:
        tile = _round_up(pl.cdiv(B, 2), 8)
    if tile >= 128:
        tile = min(_round_up(tile, 128), cap)
    return _round_up(tile, 8)


def mlp_q_kernel(f_ref, a_ref, w1a_ref, w1b_ref, b1_ref,
                 w2_ref, b2_ref, w3_ref, b3_ref, o_ref):
    # Layer 1: concat folded away -> two tiny-K matmuls (K=F and K=2) in f32
    # (MXU cost negligible at these K, so the raw inputs are not quantized).
    h1 = (jnp.dot(f_ref[...], w1a_ref[...], preferred_element_type=jnp.float32)
          + jnp.dot(a_ref[...], w1b_ref[...], preferred_element_type=jnp.float32)
          + b1_ref[...])
    h1 = jnp.maximum(h1, 0.0)

    # Layer 2: the only "real" MXU matmul (128x128); bf16 operands by default,
    # f32 accumulation; bias + ReLU in f32 (v5e VPU has no bf16).
    h2 = jnp.dot(h1.astype(w2_ref.dtype), w2_ref[...],
                 preferred_element_type=jnp.float32) + b2_ref[...]
    h2 = jnp.maximum(h2, 0.0)

    # Layer 3 (128 -> 1): N=1 MXU matmul.  At large batch tiles the MXU (vex
    # slot) has slack while a 128-lane XLU reduce would be the binding slot,
    # so the matmul placement takes the reduction off the critical path.
    o_ref[...] = (jnp.dot(h2.astype(w3_ref.dtype), w3_ref[...],
                          preferred_element_type=jnp.float32) + b3_ref[...])


def prepare_params(params, *, use_bf16=True):
    """One-time weight preprocessing. Call ONCE and reuse the result; do not
    re-run per forward call (the casts/slices are HBM round trips that would
    otherwise dominate small-batch latency)."""
    F = params["w1"].shape[0] - 2
    cdt = jnp.bfloat16 if use_bf16 else jnp.float32   # MXU operand dtype (L2/L3)
    w1 = params["w1"].astype(jnp.float32)
    return {
        "w1a": w1[:F],                                      # (F, 128) f32 feature rows
        "w1b": w1[F:],                                      # (2, 128) f32 action rows
        "b1": params["b1"].reshape(1, -1).astype(jnp.float32),
        "w2": params["w2"].astype(cdt),                     # (128, 128)
        "b2": params["b2"].reshape(1, -1).astype(jnp.float32),
        "w3": params["w3"].reshape(-1, 1).astype(cdt),      # (128, 1) column
        "b3": params["b3"].reshape(1, 1).astype(jnp.float32),
    }


def multilayer_q_forward(features, action, prepped, *, tm=1024):
    """features: (..., F), action: (..., 2) -> (B, 1) float32 Q-values."""
    w1a, w1b = prepped["w1a"], prepped["w1b"]
    F = w1a.shape[0]
    feats = features.reshape(-1, F).astype(jnp.float32)
    act = action.reshape(-1, 2).astype(jnp.float32)
    B = feats.shape[0]

    tile = _choose_tile(B, tm)
    grid = (pl.cdiv(B, tile),)        # ragged last block handled by edge masking

    cp_kwargs = dict(dimension_semantics=("parallel",))   # shards tiles across v7x TCs
    if tile >= 4096:
        # v5e scoped-VMEM default is 16 MiB; h1/h2 f32 intermediates grow ~1 KiB/row.
        cp_kwargs["vmem_limit_bytes"] = int(min(100 * 2**20, tile * 2816 + 8 * 2**20))

    out = pl.pallas_call(
        mlp_q_kernel,
        out_shape=jax.ShapeDtypeStruct((B, 1), jnp.float32),
        grid_spec=pltpu.PrefetchScalarGridSpec(
            num_scalar_prefetch=0,
            grid=grid,
            in_specs=[
                pl.BlockSpec((tile, F), lambda i: (i, 0)),        # features tile
                pl.BlockSpec((tile, 2), lambda i: (i, 0)),        # action tile
                pl.BlockSpec(w1a.shape, lambda i: (0, 0)),        # w1 (feature rows)
                pl.BlockSpec(w1b.shape, lambda i: (0, 0)),        # w1 (action rows)
                pl.BlockSpec(prepped["b1"].shape, lambda i: (0, 0)),
                pl.BlockSpec(prepped["w2"].shape, lambda i: (0, 0)),
                pl.BlockSpec(prepped["b2"].shape, lambda i: (0, 0)),
                pl.BlockSpec(prepped["w3"].shape, lambda i: (0, 0)),
                pl.BlockSpec(prepped["b3"].shape, lambda i: (0, 0)),
            ],
            out_specs=pl.BlockSpec((tile, 1), lambda i: (i, 0)),
        ),
        compiler_params=pltpu.CompilerParams(**cp_kwargs),
    )(feats, act, w1a, w1b, prepped["b1"], prepped["w2"], prepped["b2"],
      prepped["w3"], prepped["b3"])

    return out


def xavier_uniform(key, fan_in, fan_out):
    bound = math.sqrt(6.0 / (fan_in + fan_out))
    return jax.random.uniform(key, (fan_in, fan_out), jnp.float32, -bound, bound)


def init_params(key, num_features):
    d_in = num_features + 2
    k1, k2, k3 = jax.random.split(key, 3)
    return {
        "w1": xavier_uniform(k1, d_in, 128),
        "b1": jnp.full((128,), 0.1, jnp.float32),
        "w2": xavier_uniform(k2, 128, 128),
        "b2": jnp.full((128,), 0.1, jnp.float32),
        "w3": xavier_uniform(k3, 128, 1),
        "b3": jnp.full((1,), 0.1, jnp.float32),
    }


def reference_forward(features, action, params):
    F = params["w1"].shape[0] - 2
    hi = jax.lax.Precision.HIGHEST
    x = jnp.concatenate(
        [features.reshape(-1, F), action.reshape(-1, 2)], axis=1
    ).astype(jnp.float32)
    h1 = jnp.maximum(jnp.dot(x, params["w1"], precision=hi) + params["b1"], 0.0)
    h2 = jnp.maximum(jnp.dot(h1, params["w2"], precision=hi) + params["b2"], 0.0)
    return jnp.dot(h2, params["w3"], precision=hi) + params["b3"]


if __name__ == "__main__":
    key = jax.random.PRNGKey(0)
    kp, kf, ka, kf2, ka2, kf3, ka3 = jax.random.split(key, 7)

    num_features = 4   # len(config['features'])
    params = init_params(kp, num_features)
    prepped_bf16 = prepare_params(params, use_bf16=True)    # hoisted, reused below
    prepped_f32 = prepare_params(params, use_bf16=False)

    # --- small batch, f32 operands: tight check -----------------------------
    batch = 8
    features = jax.random.normal(kf, (batch, num_features), jnp.float32)
    action = jax.random.normal(ka, (batch, 2), jnp.float32)
    ref = reference_forward(features, action, params)

    out_f32 = jax.block_until_ready(multilayer_q_forward(features, action, prepped_f32))
    assert out_f32.shape == (batch, 1), out_f32.shape
    assert jnp.allclose(out_f32, ref, atol=1e-4, rtol=1e-4), "f32 mismatch vs reference"

    # --- default bf16-MXU path: looser tolerance (bf16 operands, f32 accum) --
    out_bf16 = jax.block_until_ready(multilayer_q_forward(features, action, prepped_bf16))
    assert jnp.allclose(out_bf16, ref, atol=5e-2, rtol=5e-2), "bf16 mismatch vs reference"

    # --- non-multiple batch: ragged edge block (no pad/slice), 2-step grid ---
    batch2 = 300
    features2 = jax.random.normal(kf2, (batch2, num_features), jnp.float32)
    action2 = jax.random.normal(ka2, (batch2, 2), jnp.float32)
    out2 = jax.block_until_ready(multilayer_q_forward(features2, action2, prepped_bf16))
    ref2 = reference_forward(features2, action2, params)
    assert out2.shape == (batch2, 1), out2.shape
    assert jnp.allclose(out2, ref2, atol=5e-2, rtol=5e-2), "ragged-edge mismatch"

    # --- larger batch: default 1024-row tile, multi-step parallel grid -------
    batch3 = 2500
    features3 = jax.random.normal(kf3, (batch3, num_features), jnp.float32)
    action3 = jax.random.normal(ka3, (batch3, 2), jnp.float32)
    out3 = jax.block_until_ready(multilayer_q_forward(features3, action3, prepped_bf16))
    ref3 = reference_forward(features3, action3, params)
    assert out3.shape == (batch3, 1), out3.shape
    assert jnp.allclose(out3, ref3, atol=5e-2, rtol=5e-2), "large-batch mismatch"

    print("KERNEL_OK")
</pallas_src>

<mosaic_0001>
module attributes {stable_mosaic.version = 11 : i64} {
  func.func @mlp_q_kernel(%arg0: i32, %arg1: memref<8x4xf32, #tpu.memory_space<vmem>>, %arg2: memref<8x2xf32, #tpu.memory_space<vmem>>, %arg3: memref<4x128xf32, #tpu.memory_space<vmem>>, %arg4: memref<2x128xf32, #tpu.memory_space<vmem>>, %arg5: memref<1x128xf32, #tpu.memory_space<vmem>>, %arg6: memref<128x128xf32, #tpu.memory_space<vmem>>, %arg7: memref<1x128xf32, #tpu.memory_space<vmem>>, %arg8: memref<128x1xf32, #tpu.memory_space<vmem>>, %arg9: memref<1x1xf32, #tpu.memory_space<vmem>>, %arg10: memref<8x1xf32, #tpu.memory_space<vmem>>) attributes {dimension_semantics = [#tpu.dimension_semantics<parallel>], iteration_bounds = array<i64: 1>, scalar_prefetch = 0 : i64, scratch_operands = 0 : i64, tpu.core_type = #tpu.core_type<tc>, window_params = [{transform_indices = @transform_0, window_bounds = array<i64: 8, 4>}, {transform_indices = @transform_1, window_bounds = array<i64: 8, 2>}, {pipeline_mode = #tpu.pipeline_mode<synchronous>, transform_indices = @transform_2, window_bounds = array<i64: 4, 128>}, {pipeline_mode = #tpu.pipeline_mode<synchronous>, transform_indices = @transform_3, window_bounds = array<i64: 2, 128>}, {pipeline_mode = #tpu.pipeline_mode<synchronous>, transform_indices = @transform_4, window_bounds = array<i64: 1, 128>}, {pipeline_mode = #tpu.pipeline_mode<synchronous>, transform_indices = @transform_5, window_bounds = array<i64: 128, 128>}, {pipeline_mode = #tpu.pipeline_mode<synchronous>, transform_indices = @transform_6, window_bounds = array<i64: 1, 128>}, {pipeline_mode = #tpu.pipeline_mode<synchronous>, transform_indices = @transform_7, window_bounds = array<i64: 128, 1>}, {pipeline_mode = #tpu.pipeline_mode<synchronous>, transform_indices = @transform_8, window_bounds = array<i64: 1, 1>}, {transform_indices = @transform_9, window_bounds = array<i64: 8, 1>}]} {
    %c0 = arith.constant 0 : index
    %c0_0 = arith.constant 0 : index
    %0 = vector.load %arg1[%c0, %c0_0] : memref<8x4xf32, #tpu.memory_space<vmem>>, vector<8x4xf32>
    %c0_1 = arith.constant 0 : index
    %c0_2 = arith.constant 0 : index
    %1 = vector.load %arg3[%c0_1, %c0_2] : memref<4x128xf32, #tpu.memory_space<vmem>>, vector<4x128xf32>
    %cst = arith.constant dense<0.000000e+00> : vector<8x128xf32>
    %2 = tpu.matmul %0, %1, %cst {dimension_numbers = #tpu.dot_dimension_numbers<[1], [0], [0], [1], [0, 0, 1, 1], [], []>} : vector<8x4xf32>, vector<4x128xf32>, vector<8x128xf32> -> vector<8x128xf32>
    %c0_3 = arith.constant 0 : index
    %c0_4 = arith.constant 0 : index
    %3 = vector.load %arg2[%c0_3, %c0_4] : memref<8x2xf32, #tpu.memory_space<vmem>>, vector<8x2xf32>
    %c0_5 = arith.constant 0 : index
    %c0_6 = arith.constant 0 : index
    %4 = vector.load %arg4[%c0_5, %c0_6] : memref<2x128xf32, #tpu.memory_space<vmem>>, vector<2x128xf32>
    %cst_7 = arith.constant dense<0.000000e+00> : vector<8x128xf32>
    %5 = tpu.matmul %3, %4, %cst_7 {dimension_numbers = #tpu.dot_dimension_numbers<[1], [0], [0], [1], [0, 0, 1, 1], [], []>} : vector<8x2xf32>, vector<2x128xf32>, vector<8x128xf32> -> vector<8x128xf32>
    %6 = arith.addf %2, %5 : vector<8x128xf32>
    %c0_8 = arith.constant 0 : index
    %c0_9 = arith.constant 0 : index
    %7 = vector.load %arg5[%c0_8, %c0_9] : memref<1x128xf32, #tpu.memory_space<vmem>>, vector<1x128xf32>
    %8 = vector.broadcast %7 : vector<1x128xf32> to vector<8x128xf32>
    %9 = arith.addf %6, %8 : vector<8x128xf32>
    %cst_10 = arith.constant 0.000000e+00 : f32
    %10 = vector.broadcast %cst_10 : f32 to vector<8x128xf32>
    %11 = arith.maximumf %9, %10 : vector<8x128xf32>
    %c0_11 = arith.constant 0 : index
    %c0_12 = arith.constant 0 : index
    %12 = vector.load %arg6[%c0_11, %c0_12] : memref<128x128xf32, #tpu.memory_space<vmem>>, vector<128x128xf32>
    %cst_13 = arith.constant dense<0.000000e+00> : vector<8x128xf32>
    %13 = tpu.matmul %11, %12, %cst_13 {dimension_numbers = #tpu.dot_dimension_numbers<[1], [0], [0], [1], [0, 0, 1, 1], [], []>} : vector<8x128xf32>, vector<128x128xf32>, vector<8x128xf32> -> vector<8x128xf32>
    %c0_14 = arith.constant 0 : index
    %c0_15 = arith.constant 0 : index
    %14 = vector.load %arg7[%c0_14, %c0_15] : memref<1x128xf32, #tpu.memory_space<vmem>>, vector<1x128xf32>
    %15 = vector.broadcast %14 : vector<1x128xf32> to vector<8x128xf32>
    %16 = arith.addf %13, %15 : vector<8x128xf32>
    %cst_16 = arith.constant 0.000000e+00 : f32
    %17 = vector.broadcast %cst_16 : f32 to vector<8x128xf32>
    %18 = arith.maximumf %16, %17 : vector<8x128xf32>
    %c0_17 = arith.constant 0 : index
    %c0_18 = arith.constant 0 : index
    %19 = vector.load %arg8[%c0_17, %c0_18] : memref<128x1xf32, #tpu.memory_space<vmem>>, vector<128x1xf32>
    %cst_19 = arith.constant dense<0.000000e+00> : vector<8x1xf32>
    %20 = tpu.matmul %18, %19, %cst_19 {dimension_numbers = #tpu.dot_dimension_numbers<[1], [0], [0], [1], [0, 0, 1, 1], [], []>} : vector<8x128xf32>, vector<128x1xf32>, vector<8x1xf32> -> vector<8x1xf32>
    %c0_20 = arith.constant 0 : index
    %c0_21 = arith.constant 0 : index
    %21 = vector.load %arg9[%c0_20, %c0_21] : memref<1x1xf32, #tpu.memory_space<vmem>>, vector<1x1xf32>
    %22 = vector.broadcast %21 : vector<1x1xf32> to vector<8x1xf32>
    %23 = arith.addf %20, %22 : vector<8x1xf32>
    %c0_22 = arith.constant 0 : index
    %c0_23 = arith.constant 0 : index
    %24 = vector.load %arg10[%c0_22, %c0_23] : memref<8x1xf32, #tpu.memory_space<vmem>>, vector<8x1xf32>
    tpu.vector_store %arg10[%c0_22, %c0_23], %23 {strides = array<i32>} : memref<8x1xf32, #tpu.memory_space<vmem>>, vector<8x1xf32>,
    return
  }
  func.func @transform_0(%arg0: i32) -> (i32, i32) {
    %c0_i32 = arith.constant 0 : i32
    %c0_i32_0 = arith.constant 0 : i32
    return %arg0, %c0_i32 : i32, i32
  }
  func.func @transform_1(%arg0: i32) -> (i32, i32) {
    %c0_i32 = arith.constant 0 : i32
    %c0_i32_0 = arith.constant 0 : i32
    return %arg0, %c0_i32 : i32, i32
  }
  func.func @transform_2(%arg0: i32) -> (i32, i32) {
    %c0_i32 = arith.constant 0 : i32
    %c0_i32_0 = arith.constant 0 : i32
    %c0_i32_1 = arith.constant 0 : i32
    return %c0_i32, %c0_i32_0 : i32, i32
  }
  func.func @transform_3(%arg0: i32) -> (i32, i32) {
    %c0_i32 = arith.constant 0 : i32
    %c0_i32_0 = arith.constant 0 : i32
    %c0_i32_1 = arith.constant 0 : i32
    return %c0_i32, %c0_i32_0 : i32, i32
  }
  func.func @transform_4(%arg0: i32) -> (i32, i32) {
    %c0_i32 = arith.constant 0 : i32
    %c0_i32_0 = arith.constant 0 : i32
    %c0_i32_1 = arith.constant 0 : i32
    return %c0_i32, %c0_i32_0 : i32, i32
  }
  func.func @transform_5(%arg0: i32) -> (i32, i32) {
    %c0_i32 = arith.constant 0 : i32
    %c0_i32_0 = arith.constant 0 : i32
    %c0_i32_1 = arith.constant 0 : i32
    return %c0_i32, %c0_i32_0 : i32, i32
  }
  func.func @transform_6(%arg0: i32) -> (i32, i32) {
    %c0_i32 = arith.constant 0 : i32
    %c0_i32_0 = arith.constant 0 : i32
    %c0_i32_1 = arith.constant 0 : i32
    return %c0_i32, %c0_i32_0 : i32, i32
  }
  func.func @transform_7(%arg0: i32) -> (i32, i32) {
    %c0_i32 = arith.constant 0 : i32
    %c0_i32_0 = arith.constant 0 : i32
    %c0_i32_1 = arith.constant 0 : i32
    return %c0_i32, %c0_i32_0 : i32, i32
  }
  func.func @transform_8(%arg0: i32) -> (i32, i32) {
    %c0_i32 = arith.constant 0 : i32
    %c0_i32_0 = arith.constant 0 : i32
    %c0_i32_1 = arith.constant 0 : i32
    return %c0_i32, %c0_i32_0 : i32, i32
  }
  func.func @transform_9(%arg0: i32) -> (i32, i32) {
    %c0_i32 = arith.constant 0 : i32
    %c0_i32_0 = arith.constant 0 : i32
    return %arg0, %c0_i32 : i32, i32
  }
}

</mosaic_0001>

<bundles_post_ra>
// kernel: tpu_custom_call.1
= control target key start
LH: loop header
LB: loop body
LE: loop exit
PB: predicated region body
PF: predicated region fallthrough
CT: control target
= control target key end

     0   :  { %vm42_vm0 = vcmask 1041408   ;;  %vm120_vm1 = vcmask 1043456   ;;  %v572_v0 = vmov 0.0   ;;  %vm38_vm2 = vcmask 15360   ;;  %s766_s3 = inlined_call_operand.vmem [shape: f32[2,128], index: 3, kind: input, shape index: {}]   ;;  %s767_s2 = inlined_call_operand.vmem [shape: f32[4,128], index: 2, kind: input, shape index: {}]   ;;  %s768_s1 = inlined_call_operand.vmem [shape: f32[8,2], index: 1, kind: input, shape index: {}]   ;;  %s769_s0 = inlined_call_operand.vmem [shape: f32[8,4], index: 0, kind: input, shape index: {}]   ;;  %s770_s5 = inlined_call_operand.vmem [shape: f32[128,128], index: 5, kind: input, shape index: {}]   ;;  %s771_s7 = inlined_call_operand.vmem [shape: f32[128,1], index: 7, kind: input, shape index: {}]   ;;  %s772_s4 = inlined_call_operand.vmem [shape: f32[1,128], index: 4, kind: input, shape index: {}]   ;;  %s773_s8 = inlined_call_operand.<no memory space> [shape: f32[1,1], index: 8, kind: input, shape index: {}]   ;;  %s774_s6 = inlined_call_operand.vmem [shape: f32[1,128], index: 6, kind: input, shape index: {}]   ;;  %s775_s9 = inlined_call_operand.vmem [shape: f32[8,1], index: 9, kind: output, shape index: {}]  }
   0x1   :  { %441 = vmatprep.subr.mxu0 %v572_v0  ;;  %446 = vmatprep.subr.mxu1 %v572_v0  ;;  %v37_v1 = vld [vmem:[%s766_s3] sm:$0x3]  ;;  %vm573_vm3 = vmmov 0   ;;  %vm116_vm4 = vcmask 31744   ;;  %v204_v6 = vld [vmem:[%s770_s5 + $0x8] sm:$0xff]  ;;  %v205_v8 = vld [vmem:[%s770_s5 + $0x10] sm:$0xff]  ;;  %v14_v62 = vstv %s773_s8 }
   0x2   :  { %v35_v2 = vld [vmem:[%s767_s2] sm:$0xf]  ;;  %442 = vmatpush3.msk.msra.mxu0 %vm42_vm0, %v37_v1  ;;  %443 = vmatprep.mubr.msk.f32.mxu0 %vm573_vm3, %v572_v0  ;;  %v206_v9 = vld [vmem:[%s770_s5 + $0x18] sm:$0xff]  ;;  %v574_v10 = vmov 0.0|0.0   ;;  %v208_v13 = vld [vmem:[%s770_s5 + $0x28] sm:$0xff]  ;;  %vm390_vm5 = vcmask 7168  }
   0x3   :  { %v36_v3 = vld [vmem:[%s768_s1] sm:$0xff]  ;;  %447 = vmatpush3.msk.msra.mxu1 %vm120_vm1, %v35_v2  ;;  %448 = vmatprep.mubr.msk.f32.mxu1 %vm573_vm3, %v572_v0  ;;  %v525_v11 = vpack.c.bf16 %v206_v9, %v205_v8  ;;  %v209_v15 = vld [vmem:[%s770_s5 + $0x30] sm:$0xff]  ;;  %v210_v16 = vld [vmem:[%s770_s5 + $0x38] sm:$0xff]  ;;  %15 = vst [vmem:[#allocation2] sm:$0x1] %v14_v62 }
   0x4   :  { %v34_v4 = vld [vmem:[%s769_s0] sm:$0xff]  ;;  %444 = vmatmul.mubr.msk.f32.vlgmr.msra.gmra.mrb[0].mxu0 %vm38_vm2, %v36_v3  ;;  %521 = vmatprep.subr.bf16.mxu0 %v574_v10  ;;  %v531_v17 = vpack.c.bf16 %v210_v16, %v209_v15  ;;  %v212_v19 = vld [vmem:[%s770_s5 + $0x48] sm:$0xff]  ;;  %v213_v21 = vld [vmem:[%s770_s5 + $0x50] sm:$0xff] }
   0x5   :  { %v203_v5 = vld [vmem:[%s770_s5] sm:$0xff]  ;;  %449 = vmatmul.mubr.msk.f32.vlgmr.msra.gmra.mrb[0].mxu1 %vm116_vm4, %v34_v4  ;;  %483 = vmatprep.mubr.msk.f32.mxu0 %vm573_vm3, %v572_v0  ;;  %v214_v22 = vld [vmem:[%s770_s5 + $0x58] sm:$0xff]  ;;  %v216_v25 = vld [vmem:[%s770_s5 + $0x68] sm:$0xff] }
   0x6   :  { %v522_v7 = vpack.c.bf16 %v204_v6, %v203_v5  ;;  %545 = vmatprep.subr.bf16.mxu1 %v574_v10  ;;  %v207_v12 = vld [vmem:[%s770_s5 + $0x20] sm:$0xff]  ;;  %518 = vmatprep.mubr.msk.f32.mxu1 %vm573_vm3, %v572_v0  ;;  %v537_v23 = vpack.c.bf16 %v214_v22, %v213_v21  ;;  %v217_v27 = vld [vmem:[%s770_s5 + $0x70] sm:$0xff]  ;;  %v218_v28 = vld [vmem:[%s770_s5 + $0x78] sm:$0xff] }
   0x7   :  { %v528_v14 = vpack.c.bf16 %v208_v13, %v207_v12  ;;  %v211_v18 = vld [vmem:[%s770_s5 + $0x40] sm:$0xff]  ;;  %v543_v29 = vpack.c.bf16 %v218_v28, %v217_v27  ;;  %v298_v31 = vld [vmem:[%s771_s7 + $0x8] sm:$0xff]  ;;  %v299_v32 = vld [vmem:[%s771_s7 + $0x10] sm:$0xff] }
   0x8   :  { %523 = vmatpush3.bf16.msra.mxu0 %v522_v7  ;;  %v534_v20 = vpack.c.bf16 %v212_v19, %v211_v18  ;;  %v215_v24 = vld [vmem:[%s770_s5 + $0x60] sm:$0xff]  ;;  %v300_v34 = vld [vmem:[%s771_s7 + $0x18] sm:$0xff]  ;;  %v302_v37 = vld [vmem:[%s771_s7 + $0x28] sm:$0xff] }
   0x9   :  { %524 = vmatprep.subr.bf16.mxu0 %v574_v10  ;;  %v540_v26 = vpack.c.bf16 %v216_v25, %v215_v24  ;;  %v297_v30 = vld [vmem:[%s771_s7] sm:$0xff]  ;;  %v549_v35 = vpack.c.bf16 %v300_v34, %v299_v32  ;;  %v303_v39 = vld [vmem:[%s771_s7 + $0x30] sm:$0xff]  ;;  %v304_v40 = vld [vmem:[%s771_s7 + $0x38] sm:$0xff] }
   0xa   :  { %v546_v33 = vpack.c.bf16 %v298_v31, %v297_v30  ;;  %v301_v36 = vld [vmem:[%s771_s7 + $0x20] sm:$0xff]  ;;  %v555_v41 = vpack.c.bf16 %v304_v40, %v303_v39  ;;  %v306_v43 = vld [vmem:[%s771_s7 + $0x48] sm:$0xff]  ;;  %v307_v45 = vld [vmem:[%s771_s7 + $0x50] sm:$0xff] }
   0xb   :  { %v552_v38 = vpack.c.bf16 %v302_v37, %v301_v36  ;;  %v305_v42 = vld [vmem:[%s771_s7 + $0x40] sm:$0xff]  ;;  %v308_v46 = vld [vmem:[%s771_s7 + $0x58] sm:$0xff]  ;;  %v310_v49 = vld [vmem:[%s771_s7 + $0x68] sm:$0xff] }
   0xc   :  { %526 = vmatpush3.bf16.msra.mxu0 %v525_v11  ;;  %547 = vmatpush3.bf16.msra.mxu1 %v546_v33  ;;  %v558_v44 = vpack.c.bf16 %v306_v43, %v305_v42  ;;  %v561_v47 = vpack.c.bf16 %v308_v46, %v307_v45  ;;  %v309_v48 = vld [vmem:[%s771_s7 + $0x60] sm:$0xff]  ;;  %v311_v59 = vld [vmem:[%s771_s7 + $0x70] sm:$0xff]  ;;  %v312_v60 = vld [vmem:[%s771_s7 + $0x78] sm:$0xff] }
   0xd   :  { %527 = vmatprep.subr.bf16.mxu0 %v574_v10  ;;  %548 = vmatprep.subr.bf16.mxu1 %v574_v10  ;;  %v564_v50 = vpack.c.bf16 %v310_v49, %v309_v48  ;;  %v400_v53 = vld [vmem:[%s772_s4] ss:$0 sm:$0xff]  ;;  %v567_v61 = vpack.c.bf16 %v312_v60, %v311_v59 }
   0xe   :  { %v401_v63 = vld [vmem:[%s774_s6] ss:$0 sm:$0xff] }
   0xf   :  { %v402_v4 = vld [vmem:[#allocation2] ss:$0 sm:$0xff] }
  0x10   :  { %529 = vmatpush3.bf16.msra.mxu0 %v528_v14  ;;  %550 = vmatpush3.bf16.msra.mxu1 %v549_v35 }
  0x11   :  { %530 = vmatprep.subr.bf16.mxu0 %v574_v10  ;;  %551 = vmatprep.subr.bf16.mxu1 %v574_v10 }
  0x14   :  { %532 = vmatpush3.bf16.msra.mxu0 %v531_v17  ;;  %553 = vmatpush3.bf16.msra.mxu1 %v552_v38 }
  0x15   :  { %533 = vmatprep.subr.bf16.mxu0 %v574_v10  ;;  %554 = vmatprep.subr.bf16.mxu1 %v574_v10 }
  0x18   :  { %535 = vmatpush3.bf16.msra.mxu0 %v534_v20  ;;  %556 = vmatpush3.bf16.msra.mxu1 %v555_v41 }
  0x19   :  { %536 = vmatprep.subr.bf16.mxu0 %v574_v10  ;;  %557 = vmatprep.subr.bf16.mxu1 %v574_v10 }
  0x1c   :  { %538 = vmatpush3.bf16.msra.mxu0 %v537_v23  ;;  %559 = vmatpush3.bf16.msra.mxu1 %v558_v44 }
  0x1d   :  { %539 = vmatprep.subr.bf16.mxu0 %v574_v10  ;;  %560 = vmatprep.subr.bf16.mxu1 %v574_v10 }
  0x20   :  { %541 = vmatpush3.bf16.msra.mxu0 %v540_v26  ;;  %562 = vmatpush3.bf16.msra.mxu1 %v561_v47 }
  0x21   :  { %542 = vmatprep.subr.bf16.mxu0 %v574_v10  ;;  %563 = vmatprep.subr.bf16.mxu1 %v574_v10 }
  0x24   :  { %544 = vmatpush3.bf16.msra.mxu0 %v543_v29  ;;  %565 = vmatpush3.bf16.msra.mxu1 %v564_v50 }
  0x25   :  { %566 = vmatprep.subr.bf16.mxu1 %v574_v10 }
  0x28   :  { %568 = vmatpush3.bf16.msra.mxu1 %v567_v61 }
  0xd7   :  { %v112_v51 = vpop.f32.mrb[0].mxu0 }
  0xd8   :  { %v190_v52 = vpop.f32.mrb[0].mxu1  ;;  %v445_v55 = vpop.f32.mrb[1].mxu0 }
  0xd9   :  { %v191_v54 = vadd.f32 %v190_v52, %v112_v51  ;;  %v450_v56 = vpop.f32.mrb[1].mxu1 }
  0xdb   :  { %v201_v57 = vadd.f32 %v400_v53, %v191_v54 }
  0xdd   :  { %v202_v58 = vmax.f32 %v201_v57, 0.0 }
  0xdf   :  { %484 = vmatmul.mubr.f32.vlgmr.msra.gmra.mrb[2].mxu0 %v202_v58 }
 0x1b2   :  { %v292_v0 = vpop.f32.mrb[2].mxu0 }
 0x1b3   :  { %v293_v1 = vadd.f32 %v401_v63, %v292_v0  ;;  %v485_v2 = vpop.f32.mrb[3].mxu0 }
 0x1b5   :  { %v296_v3 = vmax.f32 %v293_v1, 0.0 }
 0x1b7   :  { %519 = vmatmul.mubr.f32.vlgmr.msra.gmra.mrb[2].mxu1 %v296_v3 }
 0x28a   :  { %v386_v5 = vpop.f32.mrb[2].mxu1 }
 0x28b   :  { %v387_v6 = vadd.f32 %v402_v4, %v386_v5  ;;  %v520_v7 = vpop.f32.mrb[3].mxu1 }
 0x28d   :  { %391 = vst.msk [vmem:[%s775_s9] sm:$0xff] %vm390_vm5, %v387_v6 }

</bundles_post_ra>
